<compile_context>
chip_gen: v7x
topology: tpu7x:2x2x1
jax: 0.10.0
libtpu: 0.0.40
codegen_flags: <defaults>
</compile_context>

<pallas_src>
import functools

import jax
import jax.numpy as jnp
from jax import lax
from jax.experimental import pallas as pl
from jax.experimental.pallas import tpu as pltpu


def _round_up(n, m):
    return ((n + m - 1) // m) * m


def prepare_dictionary(dic, *, td=4096, n_splits=1, dict_dtype=jnp.bfloat16,
                       dic_stream_budget_bytes=24 * 1024 * 1024):
    """One-time dictionary packing (call once at model init).

    * transposes (D, L) -> (L, D) so the dictionary axis is lane-dense
    * casts to bf16 (halves HBM traffic for this bandwidth-bound scan)
    * zero-pads D up to n_splits * tiles_per_split * td (rectangular grid);
      padded columns are masked to -inf inside the kernel.

    n_splits: 1 for single-TC chips (v5e/v6e), 2 for v7x megacore.
    """
    D, L = dic.shape
    itemsize = jnp.dtype(dict_dtype).itemsize
    # Cap td so the double-buffered dictionary stream stays within budget on
    # every generation (v7x: 64 MiB physical / 32 MiB default scoped VMEM).
    vmem_cap = max(128, (dic_stream_budget_bytes // (2 * L * itemsize)) // 128 * 128)
    td = max(128, min(_round_up(td, 128), _round_up(D, 128), vmem_cap))

    num_tiles = pl.cdiv(D, td)
    n_splits = max(1, min(n_splits, num_tiles))
    tiles_per_split = pl.cdiv(num_tiles, n_splits)
    d_pad = n_splits * tiles_per_split * td

    dic_t = jnp.asarray(dic).T.astype(dict_dtype)            # (L, D)
    if d_pad != D:
        dic_t = jnp.pad(dic_t, ((0, 0), (0, d_pad - D)))     # (L, D_pad)

    meta = {"d_total": D, "td": td, "n_splits": n_splits,
            "tiles_per_split": tiles_per_split}
    return dic_t, meta


def _dm_kernel(d_total, x_ref, dic_ref, val_ref, idx_ref):
    """One grid step scans an (L, td) slice of the dictionary for one split."""
    c = pl.program_id(0)                     # dictionary split (parallel)
    j = pl.program_id(1)                     # tile within split (reduction)
    td = dic_ref.shape[1]
    base = (c * pl.num_programs(1) + j) * td     # global offset of this tile

    @pl.when(j == 0)
    def _():
        val_ref[...] = jnp.full_like(val_ref, -jnp.inf)
        idx_ref[...] = jnp.zeros_like(idx_ref)

    # (B, L)bf16 · (L, td)bf16 -> (B, td)f32 on the MXU; no per-tile upcast,
    # no transpose (dictionary is pre-transposed, lane-dense).
    s = jnp.dot(x_ref[...], dic_ref[...], preferred_element_type=jnp.float32)

    # Global column indices of this tile.
    cols = lax.broadcasted_iota(jnp.int32, s.shape, 1) + base

    def update(scores):
        # Per-row max and FIRST-occurrence argmax within this tile.
        local_max = jnp.max(scores, axis=1, keepdims=True)            # (B, 1)
        masked = jnp.where(scores == local_max, cols, d_total)        # sentinel
        local_idx = jnp.min(masked, axis=1, keepdims=True)            # (B, 1)
        # Strict '>' keeps the earliest index on ties across tiles/splits.
        better = local_max > val_ref[...]
        idx_ref[...] = jnp.where(better, local_idx, idx_ref[...])
        val_ref[...] = jnp.where(better, local_max, val_ref[...])

    # Only tiles that contain global indices >= d_total need the -inf mask for
    # the zero-padded dictionary tail; skip the extra VPU ops everywhere else.
    is_tail = base + td > d_total

    @pl.when(is_tail)
    def _():
        update(jnp.where(cols < d_total, s, -jnp.inf))

    @pl.when(jnp.logical_not(is_tail))
    def _():
        update(s)


def dm_forward(x, dic_t, lut, meta):
    """Pallas DM.forward: returns (B, 2) = lut[:2, argmax(dic @ x_i)].T."""
    B, L = x.shape
    d_total = meta["d_total"]
    td = meta["td"]
    n_splits = meta["n_splits"]
    tiles_per_split = meta["tiles_per_split"]
    d_pad = dic_t.shape[1]

    # Tiny (B, L) cast done once; MXU then runs native bf16 x bf16 -> f32.
    x_bf16 = x.astype(dic_t.dtype)

    kernel = functools.partial(_dm_kernel, d_total)
    itemsize = jnp.dtype(dic_t.dtype).itemsize

    cost = pl.CostEstimate(
        flops=2 * B * L * d_pad,
        transcendentals=0,
        bytes_accessed=d_pad * L * itemsize + B * L * itemsize
                       + n_splits * B * (4 + 4),
    )

    val, idx = pl.pallas_call(
        kernel,
        out_shape=(
            jax.ShapeDtypeStruct((n_splits, B, 1), jnp.float32),
            jax.ShapeDtypeStruct((n_splits, B, 1), jnp.int32),
        ),
        grid_spec=pltpu.PrefetchScalarGridSpec(
            num_scalar_prefetch=0,
            grid=(n_splits, tiles_per_split),
            in_specs=[
                # fingerprints: tiny, resident for the whole grid
                pl.BlockSpec((B, L), lambda c, j: (0, 0)),
                # pre-transposed dictionary slab: lane-dense (L, td) tiles
                pl.BlockSpec((L, td),
                             lambda c, j: (0, c * tiles_per_split + j)),
            ],
            out_specs=[
                # per-split running best score / index, resident across j
                pl.BlockSpec((None, B, 1), lambda c, j: (c, 0, 0)),
                pl.BlockSpec((None, B, 1), lambda c, j: (c, 0, 0)),
            ],
        ),
        compiler_params=pltpu.CompilerParams(
            # split axis may be sharded across TensorCores (v7x); the
            # dictionary-tile axis is a sequential online reduction.
            dimension_semantics=("parallel", "arbitrary"),
            vmem_limit_bytes=32 * 1024 * 1024,
        ),
        cost_estimate=cost,
    )(x_bf16, dic_t)

    # Merge the splits; earlier split wins ties -> torch.argmax first-occurrence.
    best_val = val[0]
    best_idx = idx[0]
    for c in range(1, n_splits):
        better = val[c] > best_val
        best_idx = jnp.where(better, idx[c], best_idx)
        best_val = jnp.where(better, val[c], best_val)

    return lut[:2, best_idx[:, 0]].T     # (B, 2) float32


def _reference(x, dic_t, lut, d_total):
    """Pure-JAX reference of the PyTorch forward (same bf16 quantization)."""
    xq = x.astype(dic_t.dtype).astype(jnp.float32)
    dicq = dic_t[:, :d_total].astype(jnp.float32)        # (L, D)
    scores = xq @ dicq                                   # (B, D)
    idx = jnp.argmax(scores, axis=1)                     # first occurrence
    return lut[:2, idx].T


if __name__ == "__main__":
    # Small, deterministic synthetic "dict.mat" contents (no file I/O).
    # D chosen non-multiple of the tile width to exercise padding/masking; a
    # small td and n_splits=2 exercise the multi-tile online argmax reduction
    # and the cross-split merge (production uses the defaults: td=4096,
    # n_splits=1 on v5e/v6e, n_splits=2 on v7x).
    B, L, D = 8, 16, 960     # batch, seq_len, dictionary entries
    key = jax.random.PRNGKey(0)
    kx, kd, kl = jax.random.split(key, 3)

    x = jax.random.normal(kx, (B, L), dtype=jnp.float32)

    dic = jax.random.normal(kd, (D, L), dtype=jnp.float32)
    # mirror the seq_len != 1000 branch: row-normalize the (truncated) dictionary
    dic = dic / jnp.sqrt(jnp.sum(jnp.square(jnp.abs(dic)), axis=1, keepdims=True))

    lut = jax.random.normal(kl, (3, D), dtype=jnp.float32)

    # One-time dictionary packing (model init), then the forward pass.
    dic_t, meta = prepare_dictionary(dic, td=256, n_splits=2)
    out = jax.block_until_ready(dm_forward(x, dic_t, lut, meta))

    # Reference uses the same bf16-quantized operands so the argmax is compared
    # apples-to-apples (bf16 streaming is a deliberate perf choice).
    ref = _reference(x, dic_t, lut, D)

    assert out.shape == (B, 2), out.shape
    assert jnp.allclose(out, ref, atol=1e-5), (out, ref)
    print("KERNEL_OK")
</pallas_src>

<mosaic_0001>
module attributes {stable_mosaic.version = 11 : i64} {
  func.func @_dm_kernel(%arg0: i32, %arg1: i32, %arg2: memref<8x16xbf16, #tpu.memory_space<vmem>>, %arg3: memref<16x256xbf16, #tpu.memory_space<vmem>>, %arg4: memref<1x8x1xf32, #tpu.memory_space<vmem>>, %arg5: memref<1x8x1xi32, #tpu.memory_space<vmem>>) attributes {dimension_semantics = [#tpu.dimension_semantics<parallel>, #tpu.dimension_semantics<arbitrary>], iteration_bounds = array<i64: 2, 2>, scalar_prefetch = 0 : i64, scratch_operands = 0 : i64, tpu.core_type = #tpu.core_type<tc>, window_params = [{pipeline_mode = #tpu.pipeline_mode<synchronous>, transform_indices = @transform_0, window_bounds = array<i64: 8, 16>}, {transform_indices = @transform_1, window_bounds = array<i64: 16, 256>}, {transform_indices = @transform_2, window_bounds = array<i64: 1, 8, 1>}, {transform_indices = @transform_3, window_bounds = array<i64: 1, 8, 1>}]} {
    %c2_i32 = arith.constant 2 : i32
    %0 = arith.muli %arg0, %c2_i32 : i32
    %1 = arith.addi %0, %arg1 : i32
    %c256_i32 = arith.constant 256 : i32
    %2 = arith.muli %1, %c256_i32 : i32
    %c0_i32 = arith.constant 0 : i32
    %3 = arith.cmpi eq, %arg1, %c0_i32 : i32
    %4 = arith.extui %3 : i1 to i32
    %c0_i32_0 = arith.constant 0 : i32
    %5 = arith.cmpi ne, %4, %c0_i32_0 : i32
    scf.if %5 {
      %cst_7 = arith.constant 0xFF800000 : f32
      %19 = vector.broadcast %cst_7 : f32 to vector<8x1xf32>
      %c0_8 = arith.constant 0 : index
      %c0_9 = arith.constant 0 : index
      %c0_10 = arith.constant 0 : index
      %20 = vector.load %arg4[%c0_8, %c0_9, %c0_10] : memref<1x8x1xf32, #tpu.memory_space<vmem>>, vector<1x8x1xf32>
      %21 = vector.shape_cast %20 : vector<1x8x1xf32> to vector<8x1xf32>
      %22 = vector.shape_cast %19 : vector<8x1xf32> to vector<1x8x1xf32>
      tpu.vector_store %arg4[%c0_8, %c0_9, %c0_10], %22 {strides = array<i32>} : memref<1x8x1xf32, #tpu.memory_space<vmem>>, vector<1x8x1xf32>,
      %c0_i32_11 = arith.constant 0 : i32
      %23 = vector.broadcast %c0_i32_11 : i32 to vector<8x1xi32>
      %c0_12 = arith.constant 0 : index
      %c0_13 = arith.constant 0 : index
      %c0_14 = arith.constant 0 : index
      %24 = vector.load %arg5[%c0_12, %c0_13, %c0_14] : memref<1x8x1xi32, #tpu.memory_space<vmem>>, vector<1x8x1xi32>
      %25 = vector.shape_cast %24 : vector<1x8x1xi32> to vector<8x1xi32>
      %26 = vector.shape_cast %23 : vector<8x1xi32> to vector<1x8x1xi32>
      tpu.vector_store %arg5[%c0_12, %c0_13, %c0_14], %26 {strides = array<i32>} : memref<1x8x1xi32, #tpu.memory_space<vmem>>, vector<1x8x1xi32>,
    } else {
    }
    %c0 = arith.constant 0 : index
    %c0_1 = arith.constant 0 : index
    %6 = vector.load %arg2[%c0, %c0_1] : memref<8x16xbf16, #tpu.memory_space<vmem>>, vector<8x16xbf16>
    %c0_2 = arith.constant 0 : index
    %c0_3 = arith.constant 0 : index
    %7 = vector.load %arg3[%c0_2, %c0_3] : memref<16x256xbf16, #tpu.memory_space<vmem>>, vector<16x256xbf16>
    %cst = arith.constant dense<0.000000e+00> : vector<8x256xf32>
    %8 = tpu.matmul %6, %7, %cst {dimension_numbers = #tpu.dot_dimension_numbers<[1], [0], [0], [1], [0, 0, 1, 1], [], []>} : vector<8x16xbf16>, vector<16x256xbf16>, vector<8x256xf32> -> vector<8x256xf32>
    %9 = tpu.iota {dimensions = array<i32: 1>} : vector<8x256xi32>
    %10 = vector.broadcast %2 : i32 to vector<8x256xi32>
    %11 = arith.addi %9, %10 : vector<8x256xi32>
    %c256_i32_4 = arith.constant 256 : i32
    %12 = arith.addi %2, %c256_i32_4 : i32
    %c960_i32 = arith.constant 960 : i32
    %13 = arith.cmpi sgt, %12, %c960_i32 : i32
    %14 = arith.extui %13 : i1 to i32
    %c0_i32_5 = arith.constant 0 : i32
    %15 = arith.cmpi ne, %14, %c0_i32_5 : i32
    scf.if %15 {
      %c960_i32_7 = arith.constant 960 : i32
      %19 = vector.broadcast %c960_i32_7 : i32 to vector<8x256xi32>
      %20 = arith.cmpi slt, %11, %19 : vector<8x256xi32>
      %cst_8 = arith.constant 0xFF800000 : f32
      %21 = vector.broadcast %cst_8 : f32 to vector<8x256xf32>
      %22 = arith.select %20, %8, %21 : vector<8x256xi1>, vector<8x256xf32>
      %cst_9 = arith.constant dense<0xFF800000> : vector<8xf32>
      %23 = vector.multi_reduction <maximumf>, %22, %cst_9 [1] : vector<8x256xf32> to vector<8xf32>
      %24 = vector.shape_cast %23 : vector<8xf32> to vector<8x1xf32>
      %25 = vector.broadcast %24 : vector<8x1xf32> to vector<8x256xf32>
      %26 = arith.cmpf oeq, %22, %25 : vector<8x256xf32>
      %c960_i32_10 = arith.constant 960 : i32
      %27 = vector.broadcast %c960_i32_10 : i32 to vector<8x256xi32>
      %28 = arith.select %26, %11, %27 : vector<8x256xi1>, vector<8x256xi32>
      %cst_11 = arith.constant dense<2147483647> : vector<8xi32>
      %29 = vector.multi_reduction <minsi>, %28, %cst_11 [1] : vector<8x256xi32> to vector<8xi32>
      %30 = vector.shape_cast %29 : vector<8xi32> to vector<8x1xi32>
      %c0_12 = arith.constant 0 : index
      %c0_13 = arith.constant 0 : index
      %c0_14 = arith.constant 0 : index
      %31 = vector.load %arg4[%c0_12, %c0_13, %c0_14] : memref<1x8x1xf32, #tpu.memory_space<vmem>>, vector<1x8x1xf32>
      %32 = vector.shape_cast %31 : vector<1x8x1xf32> to vector<8x1xf32>
      %33 = arith.cmpf ogt, %24, %32 : vector<8x1xf32>
      %c0_15 = arith.constant 0 : index
      %c0_16 = arith.constant 0 : index
      %c0_17 = arith.constant 0 : index
      %34 = vector.load %arg5[%c0_15, %c0_16, %c0_17] : memref<1x8x1xi32, #tpu.memory_space<vmem>>, vector<1x8x1xi32>
      %35 = vector.shape_cast %34 : vector<1x8x1xi32> to vector<8x1xi32>
      %36 = arith.select %33, %30, %35 : vector<8x1xi1>, vector<8x1xi32>
      %c0_18 = arith.constant 0 : index
      %c0_19 = arith.constant 0 : index
      %c0_20 = arith.constant 0 : index
      %37 = vector.load %arg5[%c0_18, %c0_19, %c0_20] : memref<1x8x1xi32, #tpu.memory_space<vmem>>, vector<1x8x1xi32>
      %38 = vector.shape_cast %37 : vector<1x8x1xi32> to vector<8x1xi32>
      %39 = vector.shape_cast %36 : vector<8x1xi32> to vector<1x8x1xi32>
      tpu.vector_store %arg5[%c0_18, %c0_19, %c0_20], %39 {strides = array<i32>} : memref<1x8x1xi32, #tpu.memory_space<vmem>>, vector<1x8x1xi32>,
      %c0_21 = arith.constant 0 : index
      %c0_22 = arith.constant 0 : index
      %c0_23 = arith.constant 0 : index
      %40 = vector.load %arg4[%c0_21, %c0_22, %c0_23] : memref<1x8x1xf32, #tpu.memory_space<vmem>>, vector<1x8x1xf32>
      %41 = vector.shape_cast %40 : vector<1x8x1xf32> to vector<8x1xf32>
      %42 = arith.select %33, %24, %41 : vector<8x1xi1>, vector<8x1xf32>
      %c0_24 = arith.constant 0 : index
      %c0_25 = arith.constant 0 : index
      %c0_26 = arith.constant 0 : index
      %43 = vector.load %arg4[%c0_24, %c0_25, %c0_26] : memref<1x8x1xf32, #tpu.memory_space<vmem>>, vector<1x8x1xf32>
      %44 = vector.shape_cast %43 : vector<1x8x1xf32> to vector<8x1xf32>
      %45 = vector.shape_cast %42 : vector<8x1xf32> to vector<1x8x1xf32>
      tpu.vector_store %arg4[%c0_24, %c0_25, %c0_26], %45 {strides = array<i32>} : memref<1x8x1xf32, #tpu.memory_space<vmem>>, vector<1x8x1xf32>,
    } else {
    }
    %true = arith.constant true
    %16 = arith.xori %13, %true : i1
    %17 = arith.extui %16 : i1 to i32
    %c0_i32_6 = arith.constant 0 : i32
    %18 = arith.cmpi ne, %17, %c0_i32_6 : i32
    scf.if %18 {
      %cst_7 = arith.constant dense<0xFF800000> : vector<8xf32>
      %19 = vector.multi_reduction <maximumf>, %8, %cst_7 [1] : vector<8x256xf32> to vector<8xf32>
      %20 = vector.shape_cast %19 : vector<8xf32> to vector<8x1xf32>
      %21 = vector.broadcast %20 : vector<8x1xf32> to vector<8x256xf32>
      %22 = arith.cmpf oeq, %8, %21 : vector<8x256xf32>
      %c960_i32_8 = arith.constant 960 : i32
      %23 = vector.broadcast %c960_i32_8 : i32 to vector<8x256xi32>
      %24 = arith.select %22, %11, %23 : vector<8x256xi1>, vector<8x256xi32>
      %cst_9 = arith.constant dense<2147483647> : vector<8xi32>
      %25 = vector.multi_reduction <minsi>, %24, %cst_9 [1] : vector<8x256xi32> to vector<8xi32>
      %26 = vector.shape_cast %25 : vector<8xi32> to vector<8x1xi32>
      %c0_10 = arith.constant 0 : index
      %c0_11 = arith.constant 0 : index
      %c0_12 = arith.constant 0 : index
      %27 = vector.load %arg4[%c0_10, %c0_11, %c0_12] : memref<1x8x1xf32, #tpu.memory_space<vmem>>, vector<1x8x1xf32>
      %28 = vector.shape_cast %27 : vector<1x8x1xf32> to vector<8x1xf32>
      %29 = arith.cmpf ogt, %20, %28 : vector<8x1xf32>
      %c0_13 = arith.constant 0 : index
      %c0_14 = arith.constant 0 : index
      %c0_15 = arith.constant 0 : index
      %30 = vector.load %arg5[%c0_13, %c0_14, %c0_15] : memref<1x8x1xi32, #tpu.memory_space<vmem>>, vector<1x8x1xi32>
      %31 = vector.shape_cast %30 : vector<1x8x1xi32> to vector<8x1xi32>
      %32 = arith.select %29, %26, %31 : vector<8x1xi1>, vector<8x1xi32>
      %c0_16 = arith.constant 0 : index
      %c0_17 = arith.constant 0 : index
      %c0_18 = arith.constant 0 : index
      %33 = vector.load %arg5[%c0_16, %c0_17, %c0_18] : memref<1x8x1xi32, #tpu.memory_space<vmem>>, vector<1x8x1xi32>
      %34 = vector.shape_cast %33 : vector<1x8x1xi32> to vector<8x1xi32>
      %35 = vector.shape_cast %32 : vector<8x1xi32> to vector<1x8x1xi32>
      tpu.vector_store %arg5[%c0_16, %c0_17, %c0_18], %35 {strides = array<i32>} : memref<1x8x1xi32, #tpu.memory_space<vmem>>, vector<1x8x1xi32>,
      %c0_19 = arith.constant 0 : index
      %c0_20 = arith.constant 0 : index
      %c0_21 = arith.constant 0 : index
      %36 = vector.load %arg4[%c0_19, %c0_20, %c0_21] : memref<1x8x1xf32, #tpu.memory_space<vmem>>, vector<1x8x1xf32>
      %37 = vector.shape_cast %36 : vector<1x8x1xf32> to vector<8x1xf32>
      %38 = arith.select %29, %20, %37 : vector<8x1xi1>, vector<8x1xf32>
      %c0_22 = arith.constant 0 : index
      %c0_23 = arith.constant 0 : index
      %c0_24 = arith.constant 0 : index
      %39 = vector.load %arg4[%c0_22, %c0_23, %c0_24] : memref<1x8x1xf32, #tpu.memory_space<vmem>>, vector<1x8x1xf32>
      %40 = vector.shape_cast %39 : vector<1x8x1xf32> to vector<8x1xf32>
      %41 = vector.shape_cast %38 : vector<8x1xf32> to vector<1x8x1xf32>
      tpu.vector_store %arg4[%c0_22, %c0_23, %c0_24], %41 {strides = array<i32>} : memref<1x8x1xf32, #tpu.memory_space<vmem>>, vector<1x8x1xf32>,
    } else {
    }
    return
  }
  func.func @transform_0(%arg0: i32, %arg1: i32) -> (i32, i32) {
    %c0_i32 = arith.constant 0 : i32
    %c0_i32_0 = arith.constant 0 : i32
    %c0_i32_1 = arith.constant 0 : i32
    return %c0_i32, %c0_i32_0 : i32, i32
  }
  func.func @transform_1(%arg0: i32, %arg1: i32) -> (i32, i32) {
    %c2_i32 = arith.constant 2 : i32
    %0 = arith.muli %arg0, %c2_i32 : i32
    %1 = arith.addi %0, %arg1 : i32
    %c0_i32 = arith.constant 0 : i32
    %c0_i32_0 = arith.constant 0 : i32
    return %c0_i32, %1 : i32, i32
  }
  func.func @transform_2(%arg0: i32, %arg1: i32) -> (i32, i32, i32) {
    %c0_i32 = arith.constant 0 : i32
    %c0_i32_0 = arith.constant 0 : i32
    %c0_i32_1 = arith.constant 0 : i32
    return %arg0, %c0_i32, %c0_i32_0 : i32, i32, i32
  }
  func.func @transform_3(%arg0: i32, %arg1: i32) -> (i32, i32, i32) {
    %c0_i32 = arith.constant 0 : i32
    %c0_i32_0 = arith.constant 0 : i32
    %c0_i32_1 = arith.constant 0 : i32
    return %arg0, %c0_i32, %c0_i32_0 : i32, i32, i32
  }
}

</mosaic_0001>

<bundles_post_ra>
// kernel: tpu_custom_call.1
= control target key start
LH: loop header
LB: loop body
LE: loop exit
PB: predicated region body
PF: predicated region fallthrough
CT: control target
= control target key end

     0   :  { %9 = vsyncpa [#allocation3], 0  ;;  %s1005_s0 = inlined_call_operand.hbm [shape: bf16[8,16], index: 0, kind: input, shape index: {}]   ;;  %s1006_s1 = inlined_call_operand.hbm [shape: bf16[16,1024], index: 1, kind: input, shape index: {}]   ;;  %s1007_s2 = inlined_call_operand.vmem [shape: f32[2,8,1], index: 2, kind: output, shape index: {0}]   ;;  %s1008_s3 = inlined_call_operand.vmem [shape: s32[2,8,1], index: 3, kind: output, shape index: {1}]  }
   0x1   :  { %10 = vsyncpa [#allocation5], 0 }
   0x2   :  { %12 = vsyncpa [#allocation5 + $0x1], 0  ;;  %s783_s12 = smov 0   ;;  %s785_s13 = smov 0  }
   0x3   :  { %s787_s14 = smov 0   ;;  %s789_s15 = smov 0  }
   0x4   :  { %s791_s16 = smov 0   ;;  %s793_s17 = smov 0  }
   0x5   :  { %s795_s18 = smov 0   ;;  %s797_s19 = smov 0  }
   0x6 LB: > { %s507_s20 = sadd.s32 4294967295, %s753_s19   ;;  %s62_s21 = sadd.s32 1, %s733_s14  ;;  %s753_s19 = sphi %s797_s19, %s18_s19   ;;  %s749_s18 = sphi %s795_s18, %s1031_s18   ;;  %s745_s17 = sphi %s793_s17, %s1030_s17   ;;  %s741_s16 = sphi %s791_s16, %s1029_s16   ;;  %s737_s15 = sphi %s789_s15, %s1028_s15   ;;  %s733_s14 = sphi %s787_s14, %s1027_s14   ;;  %s729_s13 = sphi %s785_s13, %s1026_s13   ;;  %s725_s12 = sphi %s783_s12, %s1025_s12  }
   0x7   : > { %p69_p0 = scmp.ne.s32.totalorder %s733_s14, %s729_s13  ;;  %p70_p1 = scmp.eq.s32.totalorder %s753_s19, 0 }
   0x8   : > { %p75_p2 = scmp.ne.s32.totalorder %s729_s13, %s725_s12  ;;  %p827_p3 = scmp.eq.s32.totalorder %s507_s20, 0 }
   0x9   : > { %p71_p4 = por %p70_p1, %p69_p0  ;;  %p511_p5 = scmp.ge.s32.totalorder %s753_s19, 1 }
   0xa   : > { %s1014_s22 = scalar_select %p827_p3, 1, 0 }
   0xb   : > { %p834_p6 = por %p827_p3, %p75_p2  ;;  %p138_p7 = scmp.lt.s32.totalorder %s753_s19, 5 }
   0xc   : > { %s755_s25 = smov [#allocation2]   ;;  %p549_p10 = scmp.lt.s32.totalorder %s753_s19, 4 }
   0xd   : > { %s1015_s23 = scalar_select %p834_p6, 1, 0 }
   0xe   : > { %p839_p8 = pnand %p511_p5, %p138_p7  ;;  %s151_s26 = sshll.u32 %s755_s25, 4  ;;  %s152_s26 = int_to_ptr.vmem [resolvable:$true] %s151_s26 }
   0xf   : > { %p852_p12 = pnand %p549_p10, %p71_p4  ;;  %s625_s4 = scalar_lea.hbm %s1005_s0, 64 }
  0x10   : > { %s1016_s24 = scalar_select %p839_p8, 1, 0 }
  0x11   : > { %p540_p9 = pneg %p839_p8  ;;  %p626_p13 = scmp.ne.s32.totalorder %s1005_s0, %s625_s4 }
  0x12   : > { %s1018_s28 = scalar_select %p852_p12, 1, 0 }
  0x13   : > { %p848_p11 = pnand %p540_p9, %p827_p3  ;;  %p632_p5 = scmp.lt.u32.totalorder %s625_s4, %s1005_s0 }
  0x15   : > { %p627_p0 = pneg %p848_p11 }
  0x17   : > { %p628_p1 = pnand %p627_p0, %p626_p13 }
  0x19   : > { %p629_p2 = pneg %p628_p1 }
  0x1b   : > { %p634_p4 = pnand %p632_p5, %p629_p2 }
  0x1d   : > { %637 = shalt.err (!%p634_p4)
}
  0x1e   : > { %s638_s9 = scalar_lea.vmem %s152_s26, 64  ;;  %p646_p6 = scmp.lt.s32.totalorder %s152_s26, %s152_s26 }
  0x1f   : > { %p639_p7 = scmp.ne.s32.totalorder %s152_s26, %s638_s9  ;;  %p647_p3 = scmp.lt.s32.totalorder %s638_s9, %s638_s9 }
  0x21   : > { %p641_p9 = pnand %p639_p7, %p627_p0  ;;  %p648_p8 = por %p647_p3, %p646_p6 }
  0x23   : > { %p642_p10 = pneg %p641_p9 }
  0x25   : > { %p649_p12 = pnand %p648_p8, %p642_p10 }
  0x27   : > { %652 = shalt.err (!%p649_p12)
}
  0x28   : > { %543 = dma.hbm_to_vmem [thread:$0]  (!%p848_p11), %s1005_s0, 64, %s152_s26, [#allocation3]  }
  0x29   : > { %s27_s12 = sadd.s32 1, %s745_s17  ;;  %s30_s20 = sadd.s32 1, %s749_s18 }
  0x2a   : > { %p28_p13 = scmp.ge.s32.totalorder %s27_s12, 2  ;;  %s509_s25 = sshll.u32 %s749_s18, 1 }
  0x2b   : > { %s56_s29 = sadd.s32 %s745_s17, %s509_s25  ;;  %s162_s30 = sand.u32 1, %s733_s14  }
  0x2c   : > { %s1033_s12 = smov (%p28_p13, %s27_s12), 0  ;;  %s1035_s20 = smov (!%p28_p13, %s30_s20), %s749_s18 }
  0x2d   : > { %s514_s27 = sshll.u32 %s162_s30, 4  ;;  %p32_p3 = scmp.ge.s32.totalorder %s1035_s20, 2 }
  0x2e   : > { %s533_s4 = sshll.u32 %s56_s29, 7  ;;  %s166_s5 = scalar_lea.vmem [#allocation4], %s514_s27 }
  0x2f   : > { %s175_s6 = sshll.u32 %s166_s5, 4  ;;  %s1037_s20 = smov (%p32_p3, %s1035_s20), 0  ;;  %s887_s6 = int_to_ptr.vmem [resolvable:$true] %s175_s6 }
  0x30   : > { %s885_s8 = scalar_lea.hbm %s1006_s1, %s533_s4  ;;  %s510_s9 = sshll.u32 %s1037_s20, 1 }
  0x31   : > { %s58_s10 = sadd.s32 %s510_s9, %s1033_s12  ;;  %s895_s27 = scalar_lea.sflag [#allocation5], %s162_s30 }
  0x32   : > { %s59_s11 = ssub.s32 %s56_s29, %s58_s10  ;;  %s653_s5 = scalar_lea.hbm %s885_s8, 256 }
  0x33   : > { %p891_p6 = scmp.eq.s32.totalorder %s59_s11, 0  ;;  %p654_p8 = scmp.ne.s32.totalorder %s885_s8, %s653_s5 }
  0x34   : > { %p1020_p11 = scmp.ne.s32.totalorder %s1018_s28, 0  ;;  %s658_s7 = scalar_lea.hbm %s1006_s1, 1024 }
  0x35   : > { %p659_p2 = scmp.lt.u32.totalorder %s885_s8, %s1006_s1  ;;  %p660_p5 = scmp.lt.u32.totalorder %s658_s7, %s653_s5 }
  0x36   : > { %p655_p12 = pneg %p1020_p11  ;;  %p662_p7 = scmp.lt.u32.totalorder %s653_s5, %s885_s8 }
  0x37   : > { %p661_p4 = por %p660_p5, %p659_p2 }
  0x38   : > { %p656_p0 = pnand %p655_p12, %p654_p8 }
  0x39   : > { %p663_p9 = por %p662_p7, %p661_p4 }
  0x3a   : > { %p657_p1 = pneg %p656_p0 }
  0x3c   : > { %p664_p10 = pnand %p663_p9, %p657_p1 }
  0x3e   : > { %667 = shalt.err (!%p664_p10)
}
  0x3f   : > { %s668_s30 = scalar_lea.vmem %s887_s6, 256  ;;  %s756_s10 = smov [#allocation4]  }
  0x40   : > { %p669_p13 = scmp.ne.s32.totalorder %s887_s6, %s668_s30  ;;  %s673_s11 = sshll.u32 %s756_s10, 4  ;;  %s674_s11 = int_to_ptr.vmem [resolvable:$false] %s673_s11 }
  0x41   : > { %s675_s4 = scalar_lea.vmem %s674_s11, 512  ;;  %p676_p0 = scmp.lt.s32.totalorder %s887_s6, %s674_s11 }
  0x42   : > { %p671_p3 = pnand %p669_p13, %p655_p12  ;;  %p677_p2 = scmp.lt.s32.totalorder %s675_s4, %s668_s30 }
  0x44   : > { %p672_p8 = pneg %p671_p3  ;;  %p678_p5 = por %p677_p2, %p676_p0 }
  0x46   : > { %p679_p4 = pnand %p678_p5, %p672_p8 }
  0x48   : > { %682 = shalt.err (!%p679_p4)
}
  0x49   : > { %s757_s5 = smov 512   ;;  %s758_s26 = smov 128  }
  0x4a   : > { %s759_s7 = smov 8   ;;  %p1021_p12 = scmp.ne.s32.totalorder %s1016_s24, 0 }
  0x4b   : > { %547 = dma.hbm_to_vmem [thread:$0]  (!%p1020_p11), %s885_s8, 256, %s887_s6, %s895_s27, %s757_s5, %s758_s26, %s759_s7  }
  0x4c   : > { %s928_s9 = scalar_select %p891_p6, %s733_s14, %s62_s21  }
  0x4d   : > { %187 = sbr.rel (%p1021_p12) target bundleno = 1207 (0x4b7), region = 28  ;;  %p1022_p1 = scmp.ne.s32.totalorder (!%p1021_p12), %s1014_s22, 0 }
  0x54   : > { %716 = dma.done.wait (%p1022_p1), [#allocation3], 64  }
  0x55   : > { %718 = vsyncadd (%p1022_p1), [#allocation3], 4294967232  ;;  %s193_s29 = sand.u32 1, %s729_s13   ;;  %p1023_p11 = scmp.ne.s32.totalorder %s1015_s23, 0 }
  0x56   : > { %s520_s30 = sshll.u32 %s193_s29, 4  ;;  %s194_s10 = scalar_lea.sflag [#allocation5], %s193_s29 }
  0x57   : > { %s197_s28 = scalar_lea.vmem [#allocation4], %s520_s30 }
  0x58   : > { %720 = dma.done.wait (%p1023_p11), %s194_s10, 256  }
  0x59   : > { %722 = vsyncadd (%p1023_p11), %s194_s10, 4294967040  ;;  %p226_p6 = scmp.lt.s32.totalorder %s741_s16, 1  ;;  %s523_s21 = sshll.u32 %s741_s16, 1 }
  0x5a   : > { %s944_s24 = sadd.s32 %s737_s15, %s523_s21  ;;  %p525_p7 = scmp.ne.s32.totalorder %s737_s15, 0 }
  0x5b   : > { %s1039_s16 = smov (!%p226_p6, %s741_s16), 1  ;;  %s524_s22 = sshll.u32 %s944_s24, 8  ;;  %vm242_vm0 = vcmask (!%p525_p7), 7168   ;;  %v760_v0 = vmov (!%p525_p7), -inf   ;;  %v761_v1 = vmov (!%p525_p7), 0  }
  0x5c   : > { %s521_s6 = sshll.u32 %s1039_s16, 3  ;;  %241 = sbr.rel (%p525_p7) target bundleno = 99 (0x63), region = 40 }
  0x5d   : > { %s951_s27 = scalar_lea.vmem %s1007_s2, %s521_s6  ;;  %s956_s4 = scalar_lea.vmem %s1008_s3, %s521_s6 }
  0x5e   : > { %243 = vst.msk [vmem:[%s951_s27] sm:$0xff] (!%p525_p7), %vm242_vm0, %v760_v0  ;;  %244 = vst.msk [vmem:[%s956_s4] sm:$0xff] (!%p525_p7), %vm242_vm0, %v761_v1 }
  0x63 PF: > { %v622_v2 = vld [vmem:[%s197_s28 + $0x4] ss:$8 sps:$4 sm:$0xff]   ;;  %v624_v3 = vld [vmem:[%s197_s28] ss:$8 sps:$4 sm:$0xff]   ;;  %v762_v4 = vmov 0   ;;  %vm258_vm1 = vcmask 130048   ;;  %v303_v6 = vlaneseq  ;;  %v306_v9 = vstv %s524_s22 }
  0x64   : > { %294 = vmatprep.mubr.bf16.mxu0 %v762_v4  ;;  %262 = vmatprep.subr.bf16.mxu0 %v622_v2  ;;  %v245_v5 = vld [vmem:[#allocation2] sm:$0xf]  ;;  %s961_s15 = sadd.s32 256, %s524_s22 }
  0x65   : > { %263 = vmatpush1.bf16.msra.mxu0 %v624_v3  ;;  %v304_v7 = vand.u32 127, %v303_v6  ;;  %p529_p9 = scmp.le.s32.totalorder %s961_s15, 960 }
  0x66   : > { %v341_v19 = vld [vmem:[%s951_s27] sm:$0xff] (!%p529_p9)  ;;  %vm345_vm4 = vcmask (!%p529_p9), 7168  }
  0x67   : > { %v305_v8 = vadd.s32 128, %v304_v7  ;;  %v307_v10 = vadd.s32 %v306_v9, %v304_v7  ;;  %v343_v35 = vld [vmem:[%s956_s4] sm:$0xff] (!%p529_p9) }
  0x68   : > { %528 = vmatmul.mubr.msk.bf16.vlgmr.msra.gmra.mrb[0].mxu0 %vm258_vm1, %v245_v5 }
  0x69   : > { %v308_v11 = vadd.s32 %v306_v9, %v305_v8  ;;  %vm314_vm2 = vcmp.lt.s32.totalorder (!%p529_p9), %v307_v10, 960 }
  0x6b   : > { %vm315_vm3 = vcmp.lt.s32.totalorder (!%p529_p9), %v308_v11, 960 }
 0x138   : > { %313 = sbr.rel (%p529_p9) target bundleno = 762 (0x2fa), region = 44 }
 0x13b   : > { %v296_v12 = vpop.f32.mrb[0].mxu0 }
 0x13c   : > { %v298_v13 = vpop.f32.mrb[1].mxu0  ;;  %v316_v16 = vsel (!%p529_p9), %vm314_vm2, %v296_v12, -inf }
 0x13d   : > { %v300_v14 = vpop.f32.mrb[2].mxu0  ;;  %v317_v17 = vsel (!%p529_p9), %vm315_vm3, %v298_v13, -inf }
 0x13e   : > { %v301_v15 = vpop.f32.mrb[3].mxu0  ;;  %v318_v18 = vmax.f32 (!%p529_p9), %v316_v16, %v317_v17 }
 0x140   : > { %319 = vmax.xlane.f32.xlu0 %v318_v18 }
 0x1cd   : > { %v320_v20 = vpop.xlane.xlu0 %319 }
 0x1ce   : > { %vm342_vm5 = vcmp.gt.f32.partialorder %v320_v20, %v341_v19  ;;  %vm321_vm6 = vcmp.eq.f32.partialorder %v316_v16, %v320_v20  ;;  %vm322_vm7 = vcmp.eq.f32.partialorder %v317_v17, %v320_v20 }
 0x1cf   : > { %v348_v21 = vsel %vm342_vm5, %v320_v20, %v341_v19  ;;  %v323_v22 = vsel %vm321_vm6, %v307_v10, 960  ;;  %v324_v23 = vsel %vm322_vm7, %v308_v11, 960 }
 0x1d0   : > { %349 = vst.msk [vmem:[%s951_s27] sm:$0xff] %vm345_vm4, %v348_v21  ;;  %vm325_vm8 = vcmp.lt.s32.totalorder %v323_v22, %v324_v23 }
 0x1d1   : > { %v326_v24 = vsel %vm325_vm8, %v323_v22, %v324_v23 }
 0x1d2   : > { %v328_v25 = vshra.s32 %v326_v24, 16  ;;  %v327_v27 = vand.u32 65535, %v326_v24 }
 0x1d4   : > { %v330_v26 = vcvt.s32.f32 %v328_v25  ;;  %v329_v29 = vcvt.s32.f32 %v327_v27 }
 0x1d6   : > { %331 = vmin.xlane.f32.xlu0 %v330_v26 }
 0x263   : > { %v332_v28 = vpop.xlane.xlu0 %331 }
 0x264   : > { %vm333_vm9 = vcmp.eq.f32.partialorder %v330_v26, %v332_v28  ;;  %v338_v31 = vcvt.f32.s32 %v332_v28 }
 0x265   : > { %v334_v30 = vsel %vm333_vm9, %v329_v29, inf }
 0x266   : > { %335 = vmin.xlane.f32.xlu1 %v334_v30  ;;  %v339_v33 = vshll.u32 %v338_v31, 16 }
 0x2f3   : > { %v336_v32 = vpop.xlane.xlu1 %335 }
 0x2f4   : > { %v337_v34 = vcvt.f32.s32 %v336_v32 }
 0x2f6   : > { %v340_v36 = vadd.s32 %v339_v33, %v337_v34 }
 0x2f8   : > { %v344_v37 = vsel %vm342_vm5, %v340_v36, %v343_v35 }
 0x2f9   : > { %346 = vst.msk [vmem:[%s956_s4] sm:$0xff] %vm345_vm4, %v344_v37 }
 0x2fa PF: > { %p530_p10 = scmp.gt.s32.totalorder %s961_s15, 960 }
 0x2fb   : > { %v354_v38 = vmax.f32 (!%p530_p10), %v296_v12, %v298_v13  ;;  %v377_v39 = vld [vmem:[%s951_s27] sm:$0xff] (!%p530_p10)  ;;  %vm381_vm10 = vcmask (!%p530_p10), 7168  }
 0x2fc   : > { %353 = sbr.rel (%p530_p10) target bundleno = 1207 (0x4b7), region = 48 }
 0x2fd   : > { %355 = vmax.xlane.f32.xlu0 (!%p530_p10), %v354_v38 }
 0x300   : > { %v379_v55 = vld [vmem:[%s956_s4] sm:$0xff] (!%p530_p10) }
 0x38a   : > { %v356_v40 = vpop.xlane.xlu0 %355 }
 0x38b   : > { %vm378_vm11 = vcmp.gt.f32.partialorder %v356_v40, %v377_v39  ;;  %vm357_vm12 = vcmp.eq.f32.partialorder %v296_v12, %v356_v40  ;;  %vm358_vm13 = vcmp.eq.f32.partialorder %v298_v13, %v356_v40 }
 0x38c   : > { %v384_v41 = vsel %vm378_vm11, %v356_v40, %v377_v39  ;;  %v359_v42 = vsel %vm357_vm12, %v307_v10, 960  ;;  %v360_v43 = vsel %vm358_vm13, %v308_v11, 960 }
 0x38d   : > { %385 = vst.msk [vmem:[%s951_s27] sm:$0xff] %vm381_vm10, %v384_v41  ;;  %vm361_vm14 = vcmp.lt.s32.totalorder %v359_v42, %v360_v43 }
 0x38e   : > { %v362_v44 = vsel %vm361_vm14, %v359_v42, %v360_v43 }
 0x38f   : > { %v364_v45 = vshra.s32 %v362_v44, 16  ;;  %v363_v47 = vand.u32 65535, %v362_v44 }
 0x391   : > { %v366_v46 = vcvt.s32.f32 %v364_v45  ;;  %v365_v49 = vcvt.s32.f32 %v363_v47 }
 0x393   : > { %367 = vmin.xlane.f32.xlu0 %v366_v46 }
 0x420   : > { %v368_v48 = vpop.xlane.xlu0 %367 }
 0x421   : > { %vm369_vm15 = vcmp.eq.f32.partialorder %v366_v46, %v368_v48  ;;  %v374_v51 = vcvt.f32.s32 %v368_v48 }
 0x422   : > { %v370_v50 = vsel %vm369_vm15, %v365_v49, inf }
 0x423   : > { %371 = vmin.xlane.f32.xlu1 %v370_v50  ;;  %v375_v53 = vshll.u32 %v374_v51, 16 }
 0x4b0   : > { %v372_v52 = vpop.xlane.xlu1 %371 }
 0x4b1   : > { %v373_v54 = vcvt.f32.s32 %v372_v52 }
 0x4b3   : > { %v376_v56 = vadd.s32 %v375_v53, %v373_v54 }
 0x4b5   : > { %v380_v57 = vsel %vm378_vm11, %v376_v56, %v379_v55 }
 0x4b6   : > { %382 = vst.msk [vmem:[%s956_s4] sm:$0xff] %vm381_vm10, %v380_v57 }
 0x4b7 PF: > { %s18_s19 = sadd.s32 1, %s753_s19   ;;  %s1024_s5 = smov %s1033_s12 }
 0x4b8   : > { %p15_p13 = scmp.ge.s32.totalorder %s18_s19, 6   ;;  %s1025_s12 = smov %s729_s13 }
 0x4b9   : > { %s1026_s13 = smov %s733_s14  ;;  %s1027_s14 = smov %s928_s9 }
 0x4ba   : > { %s1028_s15 = smov %s745_s17  ;;  %s1029_s16 = smov %s749_s18 }
 0x4bb   : > { %s1030_s17 = smov %s1024_s5  ;;  %s1031_s18 = smov %s1037_s20 }
 0x4bc   :  { %17 = sbr.rel (!%p15_p13) target bundleno = 6 (0x6), region = 97 }
 0x4c3   :  { %419 = vsyncpa [#allocation3], 1 }
 0x4c4   :  { %421 = vsyncpa [#allocation3 + $0x1], 1 }
 0x4c5   :  { %422 = vsyncpa [#allocation5], 1 }
 0x4c6   :  { %424 = vsyncpa [#allocation5 + $0x1], 1 }

</bundles_post_ra>
